<compile_context>
chip_gen: v5e
topology: v5e:2x2
jax: 0.10.0
libtpu: 0.0.40
codegen_flags: <defaults>
</compile_context>

<pallas_src>
import functools

import jax
import jax.numpy as jnp
from jax.experimental import pallas as pl
from jax.experimental.pallas import tpu as pltpu


def int2tuple(value, length):
    if isinstance(value, (tuple, list)):
        assert len(value) == length
        return tuple(value)
    return (value,) * length


def _adjust_params(src, tgt):
    """ZeroOp._offset_pad + ZeroOp._offset_select collapsed for one dimension.

    Returns (out_start, src_start, length) such that
      output[out_start : out_start + length] = source[src_start : src_start + length]
    and every other output position along this dim is zero.
    """
    diff = max(0, tgt - src)
    pad_left = diff - diff // 2                    # F.pad left amount
    padded = src + diff
    offset = (padded - tgt + (padded % 2)) // 2    # _offset_select
    shift = offset - pad_left                      # out[j] = src[j + shift]
    out_lo = max(0, -shift)
    out_hi = min(tgt, src - shift)
    length = max(0, out_hi - out_lo)
    return out_lo, out_lo + shift, length


def _make_paste_kernel(src_windows, dst_windows, needs_zero):
    """Kernel that (optionally) zero-fills its output block and pastes a static
    source window into a static destination window. Static slices only."""
    src_idx = tuple(slice(s, s + l) for s, l in src_windows)
    dst_idx = tuple(slice(s, s + l) for s, l in dst_windows)
    nonempty = all(l > 0 for _, l in dst_windows)

    def kernel(x_ref, o_ref):
        if needs_zero:
            o_ref[...] = jnp.zeros(o_ref.shape, o_ref.dtype)
        if nonempty:
            o_ref[dst_idx] = x_ref[src_idx]

    return kernel


@functools.partial(jax.jit, static_argnums=(1, 2, 3))
def skip_connect_pallas(x_nchw, out_size, out_channels, stride=1):
    N, C_in, H, W = x_nchw.shape
    H_out, W_out = out_size
    C_out = out_channels
    sh, sw = int2tuple(stride, len(out_size))

    # Spatial stride-subsample. No-op for stride 1; for stride > 1 a single
    # static strided slice so the Pallas kernel only DMAs reachable elements.
    xs = x_nchw if (sh == 1 and sw == 1) else x_nchw[:, :, ::sh, ::sw]
    Cs, Hs, Ws = xs.shape[1:]

    out_c0, src_c0, len_c = _adjust_params(Cs, C_out)
    out_h0, src_h0, len_h = _adjust_params(Hs, H_out)
    out_w0, src_w0, len_w = _adjust_params(Ws, W_out)

    # Zero-fill only needed when the pasted window does not cover the output.
    needs_zero = not (len_c == C_out and len_h == H_out and len_w == W_out)

    if Ws == W_out:
        # No pad/crop along W: flatten (H, W) so lanes carry a dense H*W slab
        # (wide unmasked-ish stores) and any H crop/pad is a contiguous slice
        # of the flattened axis. Reshapes are free (contiguous layout).
        x_k = xs.reshape(N, Cs, Hs * Ws)
        out_shape = (N, C_out, H_out * W_out)
        src_win = ((src_c0, len_c), (src_h0 * Ws, len_h * Ws))
        dst_win = ((out_c0, len_c), (out_h0 * W_out, len_h * W_out))
        blk_in = (None, Cs, Hs * Ws)
        blk_out = (None, C_out, H_out * W_out)
        imap = lambda n: (n, 0, 0)
    else:
        # General path: keep NCHW; W on lanes, H on sublanes, C leading.
        x_k = xs
        out_shape = (N, C_out, H_out, W_out)
        src_win = ((src_c0, len_c), (src_h0, len_h), (src_w0, len_w))
        dst_win = ((out_c0, len_c), (out_h0, len_h), (out_w0, len_w))
        blk_in = (None, Cs, Hs, Ws)
        blk_out = (None, C_out, H_out, W_out)
        imap = lambda n: (n, 0, 0, 0)

    kernel = _make_paste_kernel(src_win, dst_win, needs_zero)

    out = pl.pallas_call(
        kernel,
        out_shape=jax.ShapeDtypeStruct(out_shape, x_nchw.dtype),
        grid=(N,),
        in_specs=[pl.BlockSpec(blk_in, imap)],
        out_specs=pl.BlockSpec(blk_out, imap),
        compiler_params=pltpu.CompilerParams(
            dimension_semantics=("parallel",)),
    )(x_k)
    return out.reshape(N, C_out, H_out, W_out)


def skip_connect_ref(x_nchw, out_size, out_channels, stride=1):
    """Pure-JAX port of SkipConnect.forward (NCHW), used only for verification."""
    stride_h, stride_w = int2tuple(stride, len(out_size))
    xs = x_nchw[:, :, ::stride_h, ::stride_w]
    target = [out_channels] + list(out_size)
    pad_cfg = [(0, 0)]
    for t, s in zip(target, xs.shape[1:]):
        diff = max(0, t - s)
        pad_cfg.append((diff - diff // 2, diff // 2))
    xp = jnp.pad(xs, pad_cfg)
    slices = [slice(None)]
    for o, k in zip(xp.shape[1:], target):
        off = (o - k + int(o % 2 == 1)) // 2
        slices.append(slice(off, off + k))
    return xp[tuple(slices)]


if __name__ == "__main__":
    key = jax.random.PRNGKey(0)
    x = jax.random.normal(key, (2, 4, 16, 16), dtype=jnp.float32)  # NCHW

    configs = [
        # (out_size, out_channels, stride)
        ((16, 16), 4, 1),   # pure identity skip (lane-dense flat-copy path)
        ((8, 8), 6, 2),     # spatial stride 2 + zero-pad channels 4 -> 6
        ((12, 12), 3, 1),   # spatial center-crop + channel crop 4 -> 3
    ]
    for out_size, out_channels, stride in configs:
        got = jax.block_until_ready(
            skip_connect_pallas(x, out_size, out_channels, stride))
        want = skip_connect_ref(x, out_size, out_channels, stride)
        assert got.shape == want.shape, (got.shape, want.shape)
        assert jnp.array_equal(got, want), f"mismatch for {(out_size, out_channels, stride)}"
    print("KERNEL_OK")
</pallas_src>

<mosaic_0001>
module attributes {stable_mosaic.version = 11 : i64} {
  func.func @kernel(%arg0: i32, %arg1: memref<1x4x256xf32, #tpu.memory_space<vmem>>, %arg2: memref<1x4x256xf32, #tpu.memory_space<vmem>>) attributes {dimension_semantics = [#tpu.dimension_semantics<parallel>], iteration_bounds = array<i64: 2>, scalar_prefetch = 0 : i64, scratch_operands = 0 : i64, tpu.core_type = #tpu.core_type<tc>, window_params = [{transform_indices = @transform_0, window_bounds = array<i64: 1, 4, 256>}, {transform_indices = @transform_1, window_bounds = array<i64: 1, 4, 256>}]} {
    %c0 = arith.constant 0 : index
    %c0_0 = arith.constant 0 : index
    %c0_1 = arith.constant 0 : index
    %0 = vector.load %arg1[%c0, %c0_0, %c0_1] : memref<1x4x256xf32, #tpu.memory_space<vmem>>, vector<1x4x256xf32>
    %1 = vector.shape_cast %0 : vector<1x4x256xf32> to vector<4x256xf32>
    %c0_2 = arith.constant 0 : index
    %c0_3 = arith.constant 0 : index
    %c0_4 = arith.constant 0 : index
    %2 = vector.load %arg2[%c0_2, %c0_3, %c0_4] : memref<1x4x256xf32, #tpu.memory_space<vmem>>, vector<1x4x256xf32>
    %3 = vector.shape_cast %2 : vector<1x4x256xf32> to vector<4x256xf32>
    %4 = vector.shape_cast %1 : vector<4x256xf32> to vector<1x4x256xf32>
    tpu.vector_store %arg2[%c0_2, %c0_3, %c0_4], %4 {strides = array<i32>} : memref<1x4x256xf32, #tpu.memory_space<vmem>>, vector<1x4x256xf32>,
    return
  }
  func.func @transform_0(%arg0: i32) -> (i32, i32, i32) {
    %c0_i32 = arith.constant 0 : i32
    %c0_i32_0 = arith.constant 0 : i32
    %c0_i32_1 = arith.constant 0 : i32
    return %arg0, %c0_i32, %c0_i32_0 : i32, i32, i32
  }
  func.func @transform_1(%arg0: i32) -> (i32, i32, i32) {
    %c0_i32 = arith.constant 0 : i32
    %c0_i32_0 = arith.constant 0 : i32
    %c0_i32_1 = arith.constant 0 : i32
    return %arg0, %c0_i32, %c0_i32_0 : i32, i32, i32
  }
}

</mosaic_0001>

<bundles_post_ra>
// kernel: skip_connect_pallas.1
= control target key start
LH: loop header
LB: loop body
LE: loop exit
PB: predicated region body
PF: predicated region fallthrough
CT: control target
= control target key end

     0   :  { %s199_s6 = smov 0   ;;  %s219_s0 = inlined_call_operand.vmem [shape: f32[2,4,256], index: 0, kind: input, shape index: {}]   ;;  %s220_s1 = inlined_call_operand.vmem [shape: f32[2,4,256], index: 1, kind: output, shape index: {}]  }
   0x1 LB: > { %s174_s7 = sadd.s32 4294967295, %s201_s6   ;;  %p178_p0 = scmp.ge.s32.totalorder %s201_s6, 1  ;;  %s201_s6 = sphi %s199_s6, %s11_s6  }
   0x2   : > { %p87_p1 = scmp.lt.s32.totalorder %s201_s6, 3 }
   0x4   : > { %p88_p2 = pnand %p178_p0, %p87_p1 }
   0x5   : > { %p107_p3 = scmp.lt.s32.totalorder (!%p88_p2), %s174_s7, 1 }
   0x6   : > { %91 = sbr.rel (%p88_p2) target bundleno = 16 (0x10), region = 24 }
   0xb   : > { %s222_s7 = smov (!%p107_p3, %s174_s7), 1 }
   0xc   : > { %s185_s8 = sshll.u32 %s222_s7, 3 }
   0xd   : > { %s111_s11 = scalar_lea.vmem %s219_s0, %s185_s8  ;;  %s116_s14 = scalar_lea.vmem %s220_s1, %s185_s8 }
   0xe   : > { %v117_v0 = vld [vmem:[%s111_s11] sm:$0xff] }
   0xf   : > { %118 = vst [vmem:[%s116_s14] sm:$0xff] %v117_v0 }
  0x10 PF: > { %s11_s6 = sadd.s32 1, %s201_s6  }
  0x11   : > { %p8_p4 = scmp.ge.s32.totalorder %s11_s6, 4  }
  0x13   :  { %10 = sbr.rel (!%p8_p4) target bundleno = 1 (0x1), region = 54 }

</bundles_post_ra>
